<compile_context>
chip_gen: v5e
topology: v5e:2x2
jax: 0.10.0
libtpu: 0.0.40
codegen_flags: <defaults>
</compile_context>

<pallas_src>
import functools

import jax
import jax.numpy as jnp
from jax.experimental import pallas as pl
from jax.experimental.pallas import tpu as pltpu


def _channel_attention_kernel(x_ref, w1_ref, w2_ref, o_ref,
                              sum_ref, max_ref, *, inv_hw):
    # x_ref block: (Nb, C, chunk) — spatial chunk on the lane axis.
    s = pl.program_id(1)

    @pl.when(s == 0)
    def _init():
        sum_ref[...] = jnp.zeros_like(sum_ref)
        max_ref[...] = jnp.full_like(max_ref, -jnp.inf)

    xb = x_ref[...]                                              # (Nb, C, chunk)
    # Per-chunk partial reductions over the lane axis.
    sum_ref[...] = sum_ref[...] + jnp.sum(xb, axis=2, dtype=jnp.float32)
    max_ref[...] = jnp.maximum(max_ref[...],
                               jnp.max(xb, axis=2).astype(jnp.float32))

    @pl.when(s == pl.num_programs(1) - 1)
    def _finalize():
        nb = sum_ref.shape[0]
        avg = sum_ref[...] * inv_hw                              # (Nb, C)
        mx = max_ref[...]                                        # (Nb, C)
        pools = jnp.concatenate([avg, mx], axis=0)               # (2*Nb, C)

        w1 = w1_ref[...].astype(jnp.float32)                     # (Ch, C)
        w2 = w2_ref[...].astype(jnp.float32)                     # (C, Ch)

        # Shared MLP applied to avg & max pools in one matmul pair.
        h = jax.lax.dot_general(pools, w1, (((1,), (1,)), ((), ())),
                                preferred_element_type=jnp.float32)  # (2*Nb, Ch)
        h = jnp.maximum(h, 0.0)
        y = jax.lax.dot_general(h, w2, (((1,), (1,)), ((), ())),
                                preferred_element_type=jnp.float32)  # (2*Nb, C)

        att = jax.nn.sigmoid(y[:nb] + y[nb:])                    # (Nb, C)
        o_ref[...] = att.astype(o_ref.dtype)


def _pick_spatial_chunk(hw, c, itemsize, target_bytes=1 << 21):
    """Largest power-of-two multiple of 128 dividing hw; ~<=2 MiB per (C, chunk) tile."""
    if hw % 128 != 0:
        return hw                         # full-extent block (allowed exception)
    chunk = 128
    cand = 256
    while hw % cand == 0 and cand * c * itemsize <= target_bytes:
        chunk = cand
        cand *= 2
    return chunk


def _pick_batch_block(n, c, chunk, itemsize, target_bytes=1 << 20):
    """Pack several batch elements per block when the per-image tile is tiny."""
    nb = 1
    for cand in range(2, n + 1):
        if n % cand == 0 and cand * c * chunk * itemsize <= target_bytes:
            nb = cand
    return nb


def channel_attention(x, w1, w2, *, batch_block=None, spatial_chunk=None):
    """sigmoid(MLP(avgpool(x)) + MLP(maxpool(x))) -> (N, C, 1, 1)."""
    N, C, H, W = x.shape
    Ch = w1.shape[0]
    assert w1.shape == (Ch, C) and w2.shape == (C, Ch)
    HW = H * W
    itemsize = jnp.dtype(x.dtype).itemsize

    if spatial_chunk is None:
        spatial_chunk = _pick_spatial_chunk(HW, C, itemsize)
    assert HW % spatial_chunk == 0
    assert spatial_chunk % 128 == 0 or spatial_chunk == HW

    if batch_block is None:
        batch_block = _pick_batch_block(N, C, spatial_chunk, itemsize)
    assert N % batch_block == 0

    n_batch = N // batch_block
    n_spatial = HW // spatial_chunk

    x2 = x.reshape(N, C, HW)              # free reshape for contiguous NCHW

    kernel = functools.partial(_channel_attention_kernel, inv_hw=1.0 / HW)

    cost = pl.CostEstimate(
        flops=2 * N * C * HW + 2 * (2 * N) * Ch * C * 2,
        transcendentals=N * C,
        bytes_accessed=(x.size * itemsize
                        + (w1.size + w2.size) * jnp.dtype(w1.dtype).itemsize
                        + N * C * itemsize),
    )

    out2d = pl.pallas_call(
        kernel,
        out_shape=jax.ShapeDtypeStruct((N, C), x.dtype),
        grid_spec=pltpu.PrefetchScalarGridSpec(
            num_scalar_prefetch=0,
            grid=(n_batch, n_spatial),
            in_specs=[
                pl.BlockSpec((batch_block, C, spatial_chunk),
                             lambda n, s: (n, 0, s)),
                pl.BlockSpec((Ch, C), lambda n, s: (0, 0)),   # resident weight
                pl.BlockSpec((C, Ch), lambda n, s: (0, 0)),   # resident weight
            ],
            out_specs=pl.BlockSpec((batch_block, C), lambda n, s: (n, 0)),
            scratch_shapes=[
                pltpu.VMEM((batch_block, C), jnp.float32),    # running sum
                pltpu.VMEM((batch_block, C), jnp.float32),    # running max
            ],
        ),
        compiler_params=pltpu.CompilerParams(
            dimension_semantics=("parallel", "arbitrary")),
        cost_estimate=cost,
    )(x2, w1, w2)

    return out2d.reshape(N, C, 1, 1)


if __name__ == "__main__":
    key = jax.random.PRNGKey(0)
    N, C, H, W = 2, 64, 16, 16
    ratio = 16
    Ch = C // ratio  # = 4

    kx, k1, k2 = jax.random.split(key, 3)
    x = jax.random.normal(kx, (N, C, H, W), jnp.float32)
    # Deterministic synthetic weights matching nn.Conv2d(C, C//r, 1, bias=False)
    # and nn.Conv2d(C//r, C, 1, bias=False).
    w1 = jax.random.normal(k1, (Ch, C), jnp.float32) * (2.0 / C) ** 0.5
    w2 = jax.random.normal(k2, (C, Ch), jnp.float32) * (2.0 / Ch) ** 0.5

    # Pure-JAX reference.
    avg = jnp.mean(x, axis=(2, 3))             # (N, C)
    mx = jnp.max(x, axis=(2, 3))               # (N, C)
    mlp = lambda p: jnp.maximum(p @ w1.T, 0.0) @ w2.T
    ref = jax.nn.sigmoid(mlp(avg) + mlp(mx))[:, :, None, None]

    # 1) auto config (packs the small batch into one block, single spatial chunk).
    out = jax.block_until_ready(channel_attention(x, w1, w2))
    assert out.shape == (N, C, 1, 1)
    assert out.dtype == x.dtype
    assert jnp.allclose(out, ref, atol=1e-5, rtol=1e-5)

    # 2) forced multi-chunk reduction + multi-batch grid: exercises the
    #    running-sum / running-max accumulator path (pl.when init/finalize).
    out2 = jax.block_until_ready(
        channel_attention(x, w1, w2, batch_block=1, spatial_chunk=128))
    assert jnp.allclose(out2, ref, atol=1e-5, rtol=1e-5)

    print("KERNEL_OK")
</pallas_src>

<mosaic_0001>
module attributes {stable_mosaic.version = 11 : i64} {
  func.func @_channel_attention_kernel(%arg0: i32, %arg1: i32, %arg2: memref<2x64x256xf32, #tpu.memory_space<vmem>>, %arg3: memref<4x64xf32, #tpu.memory_space<vmem>>, %arg4: memref<64x4xf32, #tpu.memory_space<vmem>>, %arg5: memref<2x64xf32, #tpu.memory_space<vmem>>, %arg6: memref<2x64xf32, #tpu.memory_space<vmem>>, %arg7: memref<2x64xf32, #tpu.memory_space<vmem>>) attributes {dimension_semantics = [#tpu.dimension_semantics<parallel>, #tpu.dimension_semantics<arbitrary>], iteration_bounds = array<i64: 1, 1>, scalar_prefetch = 0 : i64, scratch_operands = 2 : i64, tpu.core_type = #tpu.core_type<tc>, window_params = [{transform_indices = @transform_0, window_bounds = array<i64: 2, 64, 256>}, {pipeline_mode = #tpu.pipeline_mode<synchronous>, transform_indices = @transform_1, window_bounds = array<i64: 4, 64>}, {pipeline_mode = #tpu.pipeline_mode<synchronous>, transform_indices = @transform_2, window_bounds = array<i64: 64, 4>}, {transform_indices = @transform_3, window_bounds = array<i64: 2, 64>}]} {
    %c0_i32 = arith.constant 0 : i32
    %0 = arith.cmpi eq, %arg1, %c0_i32 : i32
    %1 = arith.extui %0 : i1 to i32
    %c0_i32_0 = arith.constant 0 : i32
    %2 = arith.cmpi ne, %1, %c0_i32_0 : i32
    scf.if %2 {
      %cst_14 = arith.constant 0.000000e+00 : f32
      %15 = vector.broadcast %cst_14 : f32 to vector<2x64xf32>
      %c0_15 = arith.constant 0 : index
      %c0_16 = arith.constant 0 : index
      %16 = vector.load %arg6[%c0_15, %c0_16] : memref<2x64xf32, #tpu.memory_space<vmem>>, vector<2x64xf32>
      tpu.vector_store %arg6[%c0_15, %c0_16], %15 {strides = array<i32>} : memref<2x64xf32, #tpu.memory_space<vmem>>, vector<2x64xf32>,
      %cst_17 = arith.constant 0xFF800000 : f32
      %17 = vector.broadcast %cst_17 : f32 to vector<2x64xf32>
      %c0_18 = arith.constant 0 : index
      %c0_19 = arith.constant 0 : index
      %18 = vector.load %arg7[%c0_18, %c0_19] : memref<2x64xf32, #tpu.memory_space<vmem>>, vector<2x64xf32>
      tpu.vector_store %arg7[%c0_18, %c0_19], %17 {strides = array<i32>} : memref<2x64xf32, #tpu.memory_space<vmem>>, vector<2x64xf32>,
    } else {
    }
    %c0 = arith.constant 0 : index
    %c0_1 = arith.constant 0 : index
    %c0_2 = arith.constant 0 : index
    %3 = vector.load %arg2[%c0, %c0_1, %c0_2] : memref<2x64x256xf32, #tpu.memory_space<vmem>>, vector<2x64x256xf32>
    %c0_3 = arith.constant 0 : index
    %c0_4 = arith.constant 0 : index
    %4 = vector.load %arg6[%c0_3, %c0_4] : memref<2x64xf32, #tpu.memory_space<vmem>>, vector<2x64xf32>
    %cst = arith.constant dense<0.000000e+00> : vector<2x64xf32>
    %5 = vector.multi_reduction <add>, %3, %cst [2] : vector<2x64x256xf32> to vector<2x64xf32>
    %6 = arith.addf %4, %5 : vector<2x64xf32>
    %c0_5 = arith.constant 0 : index
    %c0_6 = arith.constant 0 : index
    %7 = vector.load %arg6[%c0_5, %c0_6] : memref<2x64xf32, #tpu.memory_space<vmem>>, vector<2x64xf32>
    tpu.vector_store %arg6[%c0_5, %c0_6], %6 {strides = array<i32>} : memref<2x64xf32, #tpu.memory_space<vmem>>, vector<2x64xf32>,
    %c0_7 = arith.constant 0 : index
    %c0_8 = arith.constant 0 : index
    %8 = vector.load %arg7[%c0_7, %c0_8] : memref<2x64xf32, #tpu.memory_space<vmem>>, vector<2x64xf32>
    %cst_9 = arith.constant dense<0xFF800000> : vector<2x64xf32>
    %9 = vector.multi_reduction <maximumf>, %3, %cst_9 [2] : vector<2x64x256xf32> to vector<2x64xf32>
    %10 = arith.maximumf %8, %9 : vector<2x64xf32>
    %c0_10 = arith.constant 0 : index
    %c0_11 = arith.constant 0 : index
    %11 = vector.load %arg7[%c0_10, %c0_11] : memref<2x64xf32, #tpu.memory_space<vmem>>, vector<2x64xf32>
    tpu.vector_store %arg7[%c0_10, %c0_11], %10 {strides = array<i32>} : memref<2x64xf32, #tpu.memory_space<vmem>>, vector<2x64xf32>,
    %c0_i32_12 = arith.constant 0 : i32
    %12 = arith.cmpi eq, %arg1, %c0_i32_12 : i32
    %13 = arith.extui %12 : i1 to i32
    %c0_i32_13 = arith.constant 0 : i32
    %14 = arith.cmpi ne, %13, %c0_i32_13 : i32
    scf.if %14 {
      %c0_14 = arith.constant 0 : index
      %c0_15 = arith.constant 0 : index
      %15 = vector.load %arg6[%c0_14, %c0_15] : memref<2x64xf32, #tpu.memory_space<vmem>>, vector<2x64xf32>
      %cst_16 = arith.constant 3.906250e-03 : f32
      %16 = vector.broadcast %cst_16 : f32 to vector<2x64xf32>
      %17 = arith.mulf %15, %16 : vector<2x64xf32>
      %c0_17 = arith.constant 0 : index
      %c0_18 = arith.constant 0 : index
      %18 = vector.load %arg7[%c0_17, %c0_18] : memref<2x64xf32, #tpu.memory_space<vmem>>, vector<2x64xf32>
      %19 = tpu.concatenate %17, %18 in 0 : vector<2x64xf32>, vector<2x64xf32> -> vector<4x64xf32>
      %c0_19 = arith.constant 0 : index
      %c0_20 = arith.constant 0 : index
      %20 = vector.load %arg3[%c0_19, %c0_20] : memref<4x64xf32, #tpu.memory_space<vmem>>, vector<4x64xf32>
      %c0_21 = arith.constant 0 : index
      %c0_22 = arith.constant 0 : index
      %21 = vector.load %arg4[%c0_21, %c0_22] : memref<64x4xf32, #tpu.memory_space<vmem>>, vector<64x4xf32>
      %cst_23 = arith.constant dense<0.000000e+00> : vector<4x4xf32>
      %22 = tpu.matmul %19, %20, %cst_23 {dimension_numbers = #tpu.dot_dimension_numbers<[1], [1], [0], [0], [0, 0, 1, 0], [], []>} : vector<4x64xf32>, vector<4x64xf32>, vector<4x4xf32> -> vector<4x4xf32>
      %cst_24 = arith.constant 0.000000e+00 : f32
      %23 = vector.broadcast %cst_24 : f32 to vector<4x4xf32>
      %24 = arith.maximumf %22, %23 : vector<4x4xf32>
      %cst_25 = arith.constant dense<0.000000e+00> : vector<4x64xf32>
      %25 = tpu.matmul %24, %21, %cst_25 {dimension_numbers = #tpu.dot_dimension_numbers<[1], [1], [0], [0], [0, 0, 1, 0], [], []>} : vector<4x4xf32>, vector<64x4xf32>, vector<4x64xf32> -> vector<4x64xf32>
      %26 = vector.extract_strided_slice %25 {offsets = [0, 0], sizes = [2, 64], strides = [1, 1]} : vector<4x64xf32> to vector<2x64xf32>
      %27 = vector.extract_strided_slice %25 {offsets = [2, 0], sizes = [2, 64], strides = [1, 1]} : vector<4x64xf32> to vector<2x64xf32>
      %28 = arith.addf %26, %27 : vector<2x64xf32>
      %29 = arith.negf %28 : vector<2x64xf32>
      %30 = math.exp %29 : vector<2x64xf32>
      %cst_26 = arith.constant 1.000000e+00 : f32
      %31 = vector.broadcast %cst_26 : f32 to vector<2x64xf32>
      %32 = arith.addf %31, %30 : vector<2x64xf32>
      %33 = arith.divf %31, %32 : vector<2x64xf32>
      %c0_27 = arith.constant 0 : index
      %c0_28 = arith.constant 0 : index
      %34 = vector.load %arg5[%c0_27, %c0_28] : memref<2x64xf32, #tpu.memory_space<vmem>>, vector<2x64xf32>
      tpu.vector_store %arg5[%c0_27, %c0_28], %33 {strides = array<i32>} : memref<2x64xf32, #tpu.memory_space<vmem>>, vector<2x64xf32>,
    } else {
    }
    return
  }
  func.func @transform_0(%arg0: i32, %arg1: i32) -> (i32, i32, i32) {
    %c0_i32 = arith.constant 0 : i32
    %c0_i32_0 = arith.constant 0 : i32
    return %arg0, %c0_i32, %arg1 : i32, i32, i32
  }
  func.func @transform_1(%arg0: i32, %arg1: i32) -> (i32, i32) {
    %c0_i32 = arith.constant 0 : i32
    %c0_i32_0 = arith.constant 0 : i32
    %c0_i32_1 = arith.constant 0 : i32
    return %c0_i32, %c0_i32_0 : i32, i32
  }
  func.func @transform_2(%arg0: i32, %arg1: i32) -> (i32, i32) {
    %c0_i32 = arith.constant 0 : i32
    %c0_i32_0 = arith.constant 0 : i32
    %c0_i32_1 = arith.constant 0 : i32
    return %c0_i32, %c0_i32_0 : i32, i32
  }
  func.func @transform_3(%arg0: i32, %arg1: i32) -> (i32, i32) {
    %c0_i32 = arith.constant 0 : i32
    %c0_i32_0 = arith.constant 0 : i32
    return %arg0, %c0_i32 : i32, i32
  }
}

</mosaic_0001>

<bundles_post_ra>
// kernel: tpu_custom_call.1
= control target key start
LH: loop header
LB: loop body
LE: loop exit
PB: predicated region body
PF: predicated region fallthrough
CT: control target
= control target key end

     0   :  { %8 = vsyncpa [#allocation5], 0  ;;  %s693_s0 = inlined_call_operand.hbm [shape: f32[2,64,256], index: 0, kind: input, shape index: {}]   ;;  %s694_s1 = inlined_call_operand.vmem [shape: f32[4,64], index: 1, kind: input, shape index: {}]   ;;  %s695_s2 = inlined_call_operand.vmem [shape: f32[64,4], index: 2, kind: input, shape index: {}]   ;;  %s696_s3 = inlined_call_operand.hbm [shape: f32[2,64], index: 3, kind: output, shape index: {}]  }
   0x1   :  { %9 = vsyncpa [#allocation6], 0  ;;  %s14_s14 = sshll.u32 %s693_s0, 4  ;;  %s497_s15 = smov [#allocation4]   ;;  %s15_s14 = int_to_ptr.hbm [resolvable:$true] %s14_s14 }
   0x2   :  { %s16_s16 = sshll.u32 %s497_s15, 4  ;;  %s498_s17 = smov 256   ;;  %s17_s16 = int_to_ptr.vmem [resolvable:$true] %s16_s16 }
   0x3   :  { %s499_s18 = smov 16  }
   0x4   :  { %22 = dma.hbm_to_vmem [thread:$0]  %s15_s14, 4096, %s17_s16, [#allocation5], %s498_s17, %s498_s17, %s499_s18  }
   0x5   :  { %493 = dma.done.wait [#allocation5], 4096  }
   0x6   :  { %494 = vsyncadd [#allocation5], 4294963200  ;;  %v54_v0 = vld [vmem:[#allocation4 + $0x80] sm:$0xff]  ;;  %v55_v1 = vld [vmem:[#allocation4 + $0x88] sm:$0xff]  ;;  %vm140_vm0 = vcmask 130112   ;;  %vm35_vm1 = vcmask 517120  }
   0x7   :  { %v38_v2 = vld [vmem:[#allocation4] sm:$0xff]  ;;  %v95_v3 = vadd.f32 %v55_v1, %v54_v0  ;;  %v39_v4 = vld [vmem:[#allocation4 + $0x8] sm:$0xff]  ;;  %v56_v7 = vld [vmem:[#allocation4 + $0x90] sm:$0xff]  ;;  %v212_v18 = vmax.f32 %v54_v0, %v55_v1  ;;  %v135_v0 = vlaneseq  ;;  %vm306_vm2 = vcmask 523264   ;;  %s413_s11 = sshll.u32 %s696_s3, 4  ;;  %s414_s11 = int_to_ptr.hbm [resolvable:$true] %s413_s11 }
   0x8   :  { %v188_v5 = vmax.f32 %v38_v2, %v39_v4  ;;  %v71_v6 = vadd.f32 %v39_v4, %v38_v2  ;;  %v57_v8 = vld [vmem:[#allocation4 + $0x98] sm:$0xff]  ;;  %v40_v9 = vld [vmem:[#allocation4 + $0x10] sm:$0xff]  ;;  %v42_v14 = vld [vmem:[#allocation4 + $0x20] sm:$0xff]  ;;  %vm144_vm3 = vcmask 195712   ;;  %vm148_vm4 = vcmask 261312  }
   0x9   :  { %96 = vadd.xlane.f32.xlu1 %v95_v3  ;;  %v41_v10 = vld [vmem:[#allocation4 + $0x18] sm:$0xff]  ;;  %v98_v11 = vadd.f32 %v57_v8, %v56_v7  ;;  %v43_v15 = vld [vmem:[#allocation4 + $0x28] sm:$0xff]  ;;  %v215_v16 = vmax.f32 %v56_v7, %v57_v8  ;;  %v58_v19 = vld [vmem:[#allocation4 + $0xa0] sm:$0xff]  ;;  %v526_v4 = vand.u32 127, %v135_v0  ;;  %vm152_vm5 = vcmask 326912  }
   0xa   :  { %189 = vmax.xlane.f32.xlu2 %v188_v5  ;;  %72 = vadd.xlane.f32.xlu0 %v71_v6  ;;  %v191_v12 = vmax.f32 %v40_v9, %v41_v10  ;;  %v74_v13 = vadd.f32 %v41_v10, %v40_v9  ;;  %v77_v17 = vadd.f32 %v43_v15, %v42_v14  ;;  %v59_v20 = vld [vmem:[#allocation4 + $0xa8] sm:$0xff]  ;;  %v60_v24 = vld [vmem:[#allocation4 + $0xb0] sm:$0xff]  ;;  %v61_v25 = vld [vmem:[#allocation4 + $0xb8] sm:$0xff]  ;;  %vm334_vm6 = vcmask 31744  }
   0xb   :  { %v194_v21 = vmax.f32 %v42_v14, %v43_v15  ;;  %v218_v22 = vmax.f32 %v58_v19, %v59_v20  ;;  %v101_v23 = vadd.f32 %v59_v20, %v58_v19  ;;  %v44_v26 = vld [vmem:[#allocation4 + $0x30] sm:$0xff]  ;;  %v45_v27 = vld [vmem:[#allocation4 + $0x38] sm:$0xff]  ;;  %v104_v28 = vadd.f32 %v61_v25, %v60_v24  ;;  %v46_v31 = vld [vmem:[#allocation4 + $0x40] sm:$0xff] }
   0xc   :  { %v197_v29 = vmax.f32 %v44_v26, %v45_v27  ;;  %v80_v30 = vadd.f32 %v45_v27, %v44_v26  ;;  %v47_v32 = vld [vmem:[#allocation4 + $0x48] sm:$0xff]  ;;  %v62_v33 = vld [vmem:[#allocation4 + $0xc0] sm:$0xff]  ;;  %v221_v37 = vmax.f32 %v60_v24, %v61_v25  ;;  %v48_v38 = vld [vmem:[#allocation4 + $0x50] sm:$0xff]  ;;  %v529_v5 = vadd.s32 4294967288, %v526_v4 }
   0xd   :  { %v63_v34 = vld [vmem:[#allocation4 + $0xc8] sm:$0xff]  ;;  %v83_v35 = vadd.f32 %v47_v32, %v46_v31  ;;  %v49_v39 = vld [vmem:[#allocation4 + $0x58] sm:$0xff]  ;;  %v200_v42 = vmax.f32 %v46_v31, %v47_v32  ;;  %v64_v43 = vld [vmem:[#allocation4 + $0xd0] sm:$0xff]  ;;  %v501_v25 = vmov -inf   ;;  %vm156_vm7 = vcmask 392512  }
   0xe   :  { %v107_v36 = vadd.f32 %v63_v34, %v62_v33  ;;  %v224_v40 = vmax.f32 %v62_v33, %v63_v34  ;;  %v86_v41 = vadd.f32 %v49_v39, %v48_v38  ;;  %v65_v44 = vld [vmem:[#allocation4 + $0xd8] sm:$0xff]  ;;  %v203_v45 = vmax.f32 %v48_v38, %v49_v39  ;;  %v66_v48 = vld [vmem:[#allocation4 + $0xe0] sm:$0xff]  ;;  %v67_v49 = vld [vmem:[#allocation4 + $0xe8] sm:$0xff]  ;;  %37 = vst.msk [vmem:[#allocation3] sm:$0x3] %vm35_vm1, %v501_v25 }
   0xf   :  { %v227_v46 = vmax.f32 %v64_v43, %v65_v44  ;;  %v110_v47 = vadd.f32 %v65_v44, %v64_v43  ;;  %v50_v50 = vld [vmem:[#allocation4 + $0x60] sm:$0xff]  ;;  %v51_v51 = vld [vmem:[#allocation4 + $0x68] sm:$0xff]  ;;  %v113_v52 = vadd.f32 %v67_v49, %v66_v48  ;;  %v52_v55 = vld [vmem:[#allocation4 + $0x70] sm:$0xff]  ;;  %v230_v61 = vmax.f32 %v66_v48, %v67_v49 }
  0x10   :  { %v206_v53 = vmax.f32 %v50_v50, %v51_v51  ;;  %v89_v54 = vadd.f32 %v51_v51, %v50_v50  ;;  %v53_v56 = vld [vmem:[#allocation4 + $0x78] sm:$0xff]  ;;  %v68_v57 = vld [vmem:[#allocation4 + $0xf0] sm:$0xff]  ;;  %v563_v33 = vadd.s32 4294967280, %v526_v4  ;;  %v566_v34 = vadd.s32 4294967272, %v526_v4 }
  0x11   :  { %99 = vadd.xlane.f32.xlu1 %v98_v11  ;;  %v69_v58 = vld [vmem:[#allocation4 + $0xf8] sm:$0xff]  ;;  %v92_v59 = vadd.f32 %v53_v56, %v52_v55  ;;  %v209_v63 = vmax.f32 %v52_v55, %v53_v56  ;;  %v574_v39 = vadd.s32 4294967256, %v526_v4  ;;  %v599_v56 = vadd.s32 4294967240, %v526_v4 }
  0x12   :  { %192 = vmax.xlane.f32.xlu2 %v191_v12  ;;  %75 = vadd.xlane.f32.xlu0 %v74_v13  ;;  %v116_v60 = vadd.f32 %v69_v58, %v68_v57  ;;  %v233_v62 = vmax.f32 %v68_v57, %v69_v58  ;;  %v305_v48 = vld [vmem:[%s695_s2 + $0x38] sm:$0xff]  ;;  %v304_v57 = vld [vmem:[%s695_s2 + $0x30] sm:$0xff]  ;;  %vm160_vm8 = vcmask 458112   ;;  %vm164_vm9 = vcmask 523712  }
  0x13   :  { %425 = vmatpush.xpose.msk.msra.mxu1 %vm334_vm6, %v305_v48  ;;  %vm181_vm10 = vcmask 1041409   ;;  %vm295_vm11 = vcmask 1041408  }
  0x17   :  { %426 = vmatpush.xpose.msk.msra.mxu1 %vm334_vm6, %v304_v57 }
  0x19   :  { %216 = vmax.xlane.f32.xlu1 %v215_v16 }
  0x1a   :  { %78 = vadd.xlane.f32.xlu2 %v77_v17  ;;  %213 = vmax.xlane.f32.xlu0 %v212_v18 }
  0x21   :  { %195 = vmax.xlane.f32.xlu1 %v194_v21  ;;  %v500_v21 = vmov 0.0  }
  0x22   :  { %219 = vmax.xlane.f32.xlu2 %v218_v22  ;;  %102 = vadd.xlane.f32.xlu0 %v101_v23  ;;  %36 = vst.msk [vmem:[#allocation2] sm:$0x3] %vm35_vm1, %v500_v21 }
  0x29   :  { %105 = vadd.xlane.f32.xlu1 %v104_v28  ;;  %v70_v21 = vld [vmem:[#allocation2] sm:$0x3] }
  0x2a   :  { %198 = vmax.xlane.f32.xlu2 %v197_v29  ;;  %81 = vadd.xlane.f32.xlu0 %v80_v30  ;;  %v297_v30 = vld [vmem:[%s694_s1] sm:$0xf] }
  0x2b   :  { %423 = vmatpush.xpose.msk.msra.mxu0 %vm306_vm2, %v297_v30 }
  0x31   :  { %84 = vadd.xlane.f32.xlu1 %v83_v35 }
  0x32   :  { %108 = vadd.xlane.f32.xlu2 %v107_v36  ;;  %222 = vmax.xlane.f32.xlu0 %v221_v37  ;;  %v571_v37 = vadd.s32 4294967264, %v526_v4 }
  0x39   :  { %225 = vmax.xlane.f32.xlu1 %v224_v40 }
  0x3a   :  { %87 = vadd.xlane.f32.xlu2 %v86_v41  ;;  %201 = vmax.xlane.f32.xlu0 %v200_v42 }
  0x41   :  { %204 = vmax.xlane.f32.xlu1 %v203_v45  ;;  %v582_v45 = vadd.s32 4294967248, %v526_v4 }
  0x42   :  { %228 = vmax.xlane.f32.xlu2 %v227_v46  ;;  %111 = vadd.xlane.f32.xlu0 %v110_v47 }
  0x49   :  { %114 = vadd.xlane.f32.xlu1 %v113_v52 }
  0x4a   :  { %207 = vmax.xlane.f32.xlu2 %v206_v53  ;;  %90 = vadd.xlane.f32.xlu0 %v89_v54 }
  0x51   :  { %93 = vadd.xlane.f32.xlu1 %v92_v59 }
  0x52   :  { %117 = vadd.xlane.f32.xlu2 %v116_v60  ;;  %231 = vmax.xlane.f32.xlu0 %v230_v61 }
  0x59   :  { %234 = vmax.xlane.f32.xlu1 %v233_v62 }
  0x5a   :  { %210 = vmax.xlane.f32.xlu0 %v209_v63 }
  0x7c   :  { %v97_v1 = vpop.xlane.xlu1 %96 }
  0x7d   :  { %v190_v2 = vpop.xlane.xlu2 %189  ;;  %v73_v3 = vpop.xlane.xlu0 %72  ;;  %v166_v42 = vperm.slane %v97_v1, %v526_v4 }
  0x7e   :  { %v252_v6 = vperm.slane %v190_v2, %v526_v4  ;;  %v137_v43 = vperm.slane %v73_v3, %v526_v4 }
  0x84   :  { %v100_v7 = vpop.xlane.xlu1 %99 }
  0x85   :  { %v193_v8 = vpop.xlane.xlu2 %192  ;;  %v76_v9 = vpop.xlane.xlu0 %75  ;;  %v167_v35 = vperm.slane %v100_v7, %v529_v5 }
  0x86   :  { %v253_v10 = vperm.slane %v193_v8, %v529_v5  ;;  %v139_v36 = vperm.slane %v76_v9, %v529_v5 }
  0x87   :  { %v168_v49 = vsel %vm140_vm0, %v167_v35, %v166_v42 }
  0x88   :  { %v534_v11 = vsel %vm140_vm0, %v253_v10, %v252_v6  ;;  %v141_v50 = vsel %vm140_vm0, %v139_v36, %v137_v43 }
  0x8c   :  { %v536_v12 = vpop.xlane.xlu1 %216 }
  0x8d   :  { %v79_v13 = vpop.xlane.xlu2 %78  ;;  %v538_v14 = vpop.xlane.xlu0 %213  ;;  %v268_v53 = vperm.slane %v536_v12, %v529_v5 }
  0x8e   :  { %v143_v44 = vperm.slane %v79_v13, %v563_v33  ;;  %v267_v0 = vperm.slane %v538_v14, %v526_v4  ;;  %v303_v4 = vld [vmem:[%s695_s2 + $0x28] sm:$0xff] }
  0x8f   :  { %427 = vmatpush.xpose.msk.msra.mxu1 %vm334_vm6, %v303_v4 }
  0x90   :  { %v145_v58 = vsel %vm144_vm3, %v143_v44, %v141_v50  ;;  %v300_v50 = vld [vmem:[%s695_s2 + $0x10] sm:$0xff] }
  0x94   :  { %v540_v15 = vpop.xlane.xlu1 %195 }
  0x95   :  { %v542_v16 = vpop.xlane.xlu2 %219  ;;  %v103_v17 = vpop.xlane.xlu0 %102 }
  0x96   :  { %v169_v46 = vperm.slane %v103_v17, %v563_v33  ;;  %v270_v5 = vperm.slane %v542_v16, %v563_v33  ;;  %v255_v16 = vperm.slane %v540_v15, %v563_v33  ;;  %v269_v15 = vsel %vm140_vm0, %v268_v53, %v267_v0 }
  0x98   :  { %v170_v61 = vsel %vm144_vm3, %v169_v46, %v168_v49 }
  0x9c   :  { %v106_v18 = vpop.xlane.xlu1 %105 }
  0x9d   :  { %v544_v19 = vpop.xlane.xlu2 %198  ;;  %v82_v20 = vpop.xlane.xlu0 %81  ;;  %v171_v51 = vperm.slane %v106_v18, %v566_v34 }
  0x9e   :  { %v147_v47 = vperm.slane %v82_v20, %v566_v34 }
  0x9f   :  { %v172_v1 = vsel %vm148_vm4, %v171_v51, %v170_v61 }
  0xa0   :  { %v149_v62 = vsel %vm148_vm4, %v147_v47, %v145_v58  ;;  %v187_v47 = vld [vmem:[#allocation3] sm:$0x3] }
  0xa1   :  { %v298_v58 = vld [vmem:[%s695_s2] sm:$0xff] }
  0xa4   :  { %v85_v22 = vpop.xlane.xlu1 %84 }
  0xa5   :  { %v109_v23 = vpop.xlane.xlu2 %108  ;;  %v547_v24 = vpop.xlane.xlu0 %222  ;;  %v151_v52 = vperm.slane %v85_v22, %v571_v37  ;;  %v257_v22 = vperm.slane %v544_v19, %v566_v34  ;;  %v302_v19 = vld [vmem:[%s695_s2 + $0x20] sm:$0xff] }
  0xa6   :  { %v173_v54 = vperm.slane %v109_v23, %v571_v37  ;;  %v272_v17 = vperm.slane %v547_v24, %v566_v34  ;;  %428 = vmatpush.xpose.msk.msra.mxu1 %vm334_vm6, %v302_v19 }
  0xa7   :  { %v153_v2 = vsel %vm152_vm5, %v151_v52, %v149_v62  ;;  %v299_v52 = vld [vmem:[%s695_s2 + $0x8] sm:$0xff] }
  0xa8   :  { %v174_v6 = vsel %vm152_vm5, %v173_v54, %v172_v1 }
  0xac   :  { %v550_v26 = vpop.xlane.xlu1 %225 }
  0xad   :  { %v88_v27 = vpop.xlane.xlu2 %87  ;;  %v552_v28 = vpop.xlane.xlu0 %201  ;;  %v274_v23 = vperm.slane %v550_v26, %v571_v37  ;;  %v271_v26 = vsel %vm144_vm3, %v270_v5, %v269_v15 }
  0xae   :  { %v155_v55 = vperm.slane %v88_v27, %v574_v39  ;;  %v259_v24 = vperm.slane %v552_v28, %v571_v37  ;;  %v256_v28 = vsel %vm144_vm3, %v255_v16, %v534_v11  ;;  %v273_v35 = vsel %vm148_vm4, %v272_v17, %v271_v26 }
  0xaf   :  { %v258_v36 = vsel %vm148_vm4, %v257_v22, %v256_v28  ;;  %v275_v37 = vsel %vm152_vm5, %v274_v23, %v273_v35 }
  0xb0   :  { %v157_v7 = vsel %vm156_vm7, %v155_v55, %v153_v2 }
  0xb4   :  { %v554_v29 = vpop.xlane.xlu1 %204 }
  0xb5   :  { %v559_v31 = vpop.xlane.xlu2 %228  ;;  %v112_v32 = vpop.xlane.xlu0 %111 }
  0xb6   :  { %v175_v59 = vperm.slane %v112_v32, %v574_v39  ;;  %v276_v27 = vperm.slane %v559_v31, %v574_v39  ;;  %v261_v32 = vperm.slane %v554_v29, %v574_v39  ;;  %v260_v29 = vsel %vm152_vm5, %v259_v24, %v258_v36 }
  0xb8   :  { %v176_v12 = vsel %vm156_vm7, %v175_v59, %v174_v6  ;;  %v277_v39 = vsel %vm156_vm7, %v276_v27, %v275_v37  ;;  %v262_v42 = vsel %vm156_vm7, %v261_v32, %v260_v29 }
  0xbc   :  { %v115_v38 = vpop.xlane.xlu1 %114 }
  0xbd   :  { %v576_v40 = vpop.xlane.xlu2 %207  ;;  %v91_v41 = vpop.xlane.xlu0 %90  ;;  %v177_v63 = vperm.slane %v115_v38, %v582_v45 }
  0xbe   :  { %v159_v60 = vperm.slane %v91_v41, %v582_v45  ;;  %v263_v31 = vperm.slane %v576_v40, %v582_v45  ;;  %v301_v40 = vld [vmem:[%s695_s2 + $0x18] sm:$0xff]  ;;  %s502_s2 = smov [#allocation7]  }
  0xbf   :  { %v178_v18 = vsel %vm160_vm8, %v177_v63, %v176_v12  ;;  %429 = vmatpush.xpose.msk.msra.mxu1 %vm334_vm6, %v301_v40  ;;  %s411_s8 = sshll.u32 %s502_s2, 4  ;;  %s412_s8 = int_to_ptr.vmem [resolvable:$true] %s411_s8 }
  0xc0   :  { %v161_v13 = vsel %vm160_vm8, %v159_v60, %v157_v7 }
  0xc3   :  { %430 = vmatpush.xpose.msk.msra.mxu1 %vm334_vm6, %v300_v50 }
  0xc4   :  { %v94_v3 = vpop.xlane.xlu1 %93 }
  0xc5   :  { %v163_v8 = vperm.slane %v94_v3, %v599_v56  ;;  %v118_v9 = vpop.xlane.xlu2 %117  ;;  %v232_v10 = vpop.xlane.xlu0 %231 }
  0xc6   :  { %v179_v14 = vperm.slane %v118_v9, %v599_v56  ;;  %v278_v34 = vperm.slane %v232_v10, %v582_v45  ;;  %v264_v45 = vsel %vm160_vm8, %v263_v31, %v262_v42 }
  0xc7   :  { %v165_v20 = vsel %vm164_vm9, %v163_v8, %v161_v13  ;;  %431 = vmatpush.xpose.msk.msra.mxu1 %vm334_vm6, %v299_v52 }
  0xc8   :  { %v180_v25 = vsel %vm164_vm9, %v179_v14, %v178_v18  ;;  %v279_v43 = vsel %vm160_vm8, %v278_v34, %v277_v39 }
  0xc9   :  { %v182_v30 = vsel %vm181_vm10, %v180_v25, %v165_v20 }
  0xca   :  { %v184_v33 = vadd.f32 %v182_v30, %v70_v21 }
  0xcb   :  { %432 = vmatpush.xpose.msk.msra.mxu1 %vm334_vm6, %v298_v58 }
  0xcc   :  { %186 = vst.msk [vmem:[#allocation2] sm:$0x3] %vm35_vm1, %v184_v33  ;;  %v235_v38 = vpop.xlane.xlu1 %234 }
  0xcd   :  { %v280_v11 = vperm.slane %v235_v38, %v599_v56  ;;  %v211_v41 = vpop.xlane.xlu0 %210 }
  0xce   :  { %v265_v44 = vperm.slane %v211_v41, %v599_v56 }
  0xcf   :  { %v281_v46 = vsel %vm164_vm9, %v280_v11, %v279_v43 }
  0xd0   :  { %v266_v48 = vsel %vm164_vm9, %v265_v44, %v264_v45 }
  0xd1   :  { %v282_v49 = vsel %vm181_vm10, %v281_v46, %v266_v48 }
  0xd2   :  { %v284_v51 = vmax.f32 %v187_v47, %v282_v49 }
  0xd3   :  { %v289_v53 = vld [vmem:[#allocation2] sm:$0x3] }
  0xd4   :  { %285 = vst.msk [vmem:[#allocation3] sm:$0x3] %vm35_vm1, %v284_v51  ;;  %v290_v55 = vmul.f32 0.00390625, %v289_v53 }
  0xdb   :  { %v291_v54 = vld [vmem:[#allocation3] sm:$0x3] }
  0xdc   :  { %v293_v56 = vrot.slane %v291_v54, 6 }
  0xde   :  { %v296_v57 = vsel %vm295_vm11, %v290_v55, %v293_v56 }
  0xdf   :  { %424 = vmatmul.msk.f32.vlgmr.msra.gmra.mxu0 %vm306_vm2, %v296_v57 }
 0x15c   :  { %v330_v59 = vpop.f32.mrf.mxu0 }
 0x15d   :  { %v333_v60 = vmax.f32 %v330_v59, 0.0 }
 0x15f   :  { %433 = vmatmul.msk.f32.vlgmr.msra.gmra.mxu1 %vm334_vm6, %v333_v60 }
 0x1dc   :  { %v379_v61 = vpop.f32.mrf.mxu1 }
 0x1dd   :  { %v383_v62 = vrot.slane %v379_v61, 2 }
 0x1df   :  { %v385_v63 = vadd.f32 %v383_v62, %v379_v61 }
 0x1e1   :  { %v434_v0 = vmul.f32 -1.442695, %v385_v63 }
 0x1e3   :  { %441 = vpow2.f32 %v434_v0 }
 0x1e9   :  { %v442_v1 = vpop.eup %441 }
 0x1ea   :  { %v389_v2 = vadd.f32 1.0, %v442_v1 }
 0x1ec   :  { %443 = vrcp.f32 %v389_v2  ;;  %v401_v7 = vand.u32 2147483648, %v389_v2  ;;  %v399_v9 = vand.u32 2147483647, %v389_v2  ;;  %vm395_vm13 = vweird.f32 %v389_v2 }
 0x1ee   :  { %v402_v4 = vor.u32 1.1754944e-38, %v401_v7  ;;  %vm400_vm15 = vcmp.eq.f32.partialorder %v399_v9, 8.507059e+37 }
 0x1f2   :  { %v444_v3 = vpop.eup %443 }
 0x1f3   :  { %v391_v5 = vmul.f32 %v444_v3, %v389_v2  ;;  %vm396_vm12 = vweird.f32 %v444_v3 }
 0x1f4   :  { %vm397_vm14 = vmor %vm395_vm13, %vm396_vm12 }
 0x1f5   :  { %v392_v6 = vsub.f32 1.0, %v391_v5 }
 0x1f7   :  { %v393_v8 = vmul.f32 %v444_v3, %v392_v6 }
 0x1f9   :  { %v394_v10 = vadd.f32 %v444_v3, %v393_v8 }
 0x1fb   :  { %v398_v12 = vsel %vm397_vm14, %v444_v3, %v394_v10 }
 0x1fc   :  { %v403_v13 = vsel %vm400_vm15, %v402_v4, %v398_v12 }
 0x1fd   :  { %405 = vst.msk [vmem:[#allocation7] sm:$0x3] %vm35_vm1, %v403_v13 }
 0x1fe   :  { %416 = dma.vmem_to_hbm [thread:$0]  %s412_s8, 32, %s414_s11, [#allocation6]  }
 0x1ff   :  { %495 = dma.done.wait [#allocation6], 32  }
 0x200   :  { %496 = vsyncadd [#allocation6], 4294967264 }
 0x201   :  { %421 = vsyncpa [#allocation5], 1 }
 0x202   :  { %422 = vsyncpa [#allocation6], 1 }

</bundles_post_ra>
